<compile_context>
chip_gen: v6e
topology: v6e:2x2x1
jax: 0.10.0
libtpu: 0.0.40
codegen_flags: <defaults>
</compile_context>

<pallas_src>
import functools
import math

import jax
import jax.numpy as jnp
from jax import lax
from jax.experimental import pallas as pl
from jax.experimental.pallas import tpu as pltpu


def _round_up(a, b):
    return (a + b - 1) // b * b


def _cdiv(a, b):
    return (a + b - 1) // b


_TILE_CANDIDATES = (2048, 1024, 512, 256, 128)


def _vmem_limit_bytes():
    """VMEM limit that is safe on every generation (v7x: 64 MiB per core)."""
    limit = 48 * 1024 * 1024
    try:
        cap = getattr(pltpu.get_tpu_info(), "vmem_capacity_bytes", None)
        if cap:
            limit = min(limit, (int(cap) * 3) // 4)
    except Exception:
        pass
    return limit


def _choose_tiles(n, f_out_pad, adj_itemsize, src_row_bytes, const_bytes, budget):
    """Largest (tm, tk) adj tile fitting the VMEM budget.

    Keeps >= 2 row tiles when N allows so the 'parallel' row axis can be
    sharded across both TensorCores on v7x instead of one giant row tile.
    """
    n_ceil = _round_up(n, 128)
    want_split = n_ceil >= 256
    best_key, best = None, (128, 128)
    for tm_c in _TILE_CANDIDATES:
        tm = min(tm_c, n_ceil)
        if want_split and tm > 128 and _cdiv(n_ceil, tm) < 2:
            continue
        for tk_c in _TILE_CANDIDATES:
            tk = min(tk_c, n_ceil)
            use = (2 * tm * tk * adj_itemsize      # adj tile, double-buffered
                   + 2 * tm * f_out_pad * 4        # resident f32 output block
                   + 2 * tk * src_row_bytes        # X / support tile
                   + const_bytes)                  # W + bias (resident)
            if use > budget:
                continue
            key = (tm * tk, tk, tm)
            if best_key is None or key > best_key:
                best_key, best = key, (tm, tk)
    return best


def _gcn_fused_kernel(x_ref, w_ref, adj_ref, b_ref, o_ref, *,
                      n_nodes, tk, ragged):
    """One (row-tile i, contraction-tile k) step of adj @ (X @ W) + bias,
    recomputing the (tk, F_out_pad) support block in-kernel (F_in small)."""
    k = pl.program_id(1)

    @pl.when(k == 0)
    def _init():
        o_ref[...] = jnp.zeros_like(o_ref)

    # support block for adj columns [k*tk, (k+1)*tk): (tk, F_in) @ (F_in, Fo)
    support = jnp.dot(x_ref[...], w_ref[...],
                      preferred_element_type=jnp.float32)
    adj = adj_ref[...].astype(jnp.bfloat16)
    if ragged:
        # The last contraction tile reaches past node N: zero BOTH the
        # out-of-range support rows and adj columns so undefined padding
        # (possibly NaN/Inf) can never contribute (0 * 0 == 0).
        row = k * tk + lax.broadcasted_iota(jnp.int32, (tk, 1), 0)
        col = k * tk + lax.broadcasted_iota(jnp.int32, (1, tk), 1)
        support = jnp.where(row < n_nodes, support, 0.0)
        adj = jnp.where(col < n_nodes, adj, jnp.zeros_like(adj))

    # main contraction: (tm, tk) @ (tk, Fo), accumulated in f32 directly into
    # the resident output block (its index_map ignores k).
    o_ref[...] += jnp.dot(adj, support.astype(jnp.bfloat16),
                          preferred_element_type=jnp.float32)

    @pl.when(k == pl.num_programs(1) - 1)
    def _finalize():
        o_ref[...] += b_ref[...]


def _gcn_support_kernel(s_ref, adj_ref, b_ref, o_ref, *,
                        n_nodes, tk, ragged):
    """One (row-tile i, contraction-tile k) step of adj @ support + bias with a
    precomputed bf16 support = X @ W streamed from HBM (F_in large)."""
    k = pl.program_id(1)

    @pl.when(k == 0)
    def _init():
        o_ref[...] = jnp.zeros_like(o_ref)

    support = s_ref[...]
    adj = adj_ref[...].astype(jnp.bfloat16)
    if ragged:
        row = k * tk + lax.broadcasted_iota(jnp.int32, (tk, 1), 0)
        col = k * tk + lax.broadcasted_iota(jnp.int32, (1, tk), 1)
        support = jnp.where(row < n_nodes, support, jnp.zeros_like(support))
        adj = jnp.where(col < n_nodes, adj, jnp.zeros_like(adj))

    o_ref[...] += jnp.dot(adj, support, preferred_element_type=jnp.float32)

    @pl.when(k == pl.num_programs(1) - 1)
    def _finalize():
        o_ref[...] += b_ref[...]


@jax.jit
def graph_convolution(x, adj, weight, bias=None):
    """GCN forward: adj @ (x @ weight) + bias.

    x: (N, F_in) f32, adj: (N, N) f32 or bf16 (streamed as-is, cast to bf16
    in-kernel), weight: (F_in, F_out), bias: (F_out,) or None.
    Returns (N, F_out) f32.
    """
    N, F_in = x.shape
    F_out = weight.shape[1]
    if bias is None:
        bias = jnp.zeros((F_out,), jnp.float32)

    # Lane-dense output / weight columns (F_out -> multiple of 128).
    F_out_pad = _round_up(F_out, 128)
    w_pad = jnp.pad(weight.astype(jnp.float32),
                    ((0, 0), (0, F_out_pad - F_out)))
    b_pad = jnp.pad(bias.astype(jnp.float32),
                    (0, F_out_pad - F_out)).reshape(1, F_out_pad)

    fused = F_in <= F_out_pad      # recompute X@W in-kernel only while cheap
    vmem_limit = _vmem_limit_bytes()
    tile_budget = (vmem_limit * 4) // 5          # headroom for compiler scratch
    adj_isize = jnp.dtype(adj.dtype).itemsize
    const_bytes = 2 * 8 * F_out_pad * 4          # bias block (padded)
    if fused:
        src_row_bytes = F_in * 2                 # bf16 X rows
        const_bytes += 2 * F_in * F_out_pad * 2  # bf16 W, resident
    else:
        src_row_bytes = F_out_pad * 2            # bf16 support rows

    tm, tk = _choose_tiles(N, F_out_pad, adj_isize, src_row_bytes,
                           const_bytes, tile_budget)
    grid = (_cdiv(N, tm), _cdiv(N, tk))
    ragged = (N % tk) != 0

    adj_spec = pl.BlockSpec((tm, tk), lambda i, k: (i, k))
    bias_spec = pl.BlockSpec((1, F_out_pad), lambda i, k: (0, 0))
    out_spec = pl.BlockSpec((tm, F_out_pad), lambda i, k: (i, 0))

    if fused:
        kernel = functools.partial(_gcn_fused_kernel,
                                   n_nodes=N, tk=tk, ragged=ragged)
        in_specs = [
            pl.BlockSpec((tk, F_in), lambda i, k: (k, 0)),         # X rows
            pl.BlockSpec((F_in, F_out_pad), lambda i, k: (0, 0)),  # W (resident)
            adj_spec,
            bias_spec,
        ]
        operands = (x.astype(jnp.bfloat16), w_pad.astype(jnp.bfloat16),
                    adj, b_pad)
        flops = 2 * grid[0] * grid[1] * tk * F_out_pad * (tm + F_in)
        src_bytes = grid[0] * N * F_in * 2 + F_in * F_out_pad * 2
    else:
        # F_in >> F_out_pad: precompute support once (tiny vs adj traffic) and
        # stream (tk, F_out_pad) bf16 support blocks instead of wide X blocks.
        support = jnp.dot(x, w_pad,
                          preferred_element_type=jnp.float32
                          ).astype(jnp.bfloat16)
        kernel = functools.partial(_gcn_support_kernel,
                                   n_nodes=N, tk=tk, ragged=ragged)
        in_specs = [
            pl.BlockSpec((tk, F_out_pad), lambda i, k: (k, 0)),    # support rows
            adj_spec,
            bias_spec,
        ]
        operands = (support, adj, b_pad)
        flops = 2 * grid[0] * grid[1] * tm * tk * F_out_pad
        src_bytes = grid[0] * N * F_out_pad * 2

    bytes_accessed = (grid[0] * grid[1] * tm * tk * adj_isize
                      + src_bytes + N * F_out_pad * 4)

    out_padded = pl.pallas_call(
        kernel,
        out_shape=jax.ShapeDtypeStruct((N, F_out_pad), jnp.float32),
        grid_spec=pltpu.PrefetchScalarGridSpec(
            num_scalar_prefetch=0,
            grid=grid,
            in_specs=in_specs,
            out_specs=out_spec,
        ),
        compiler_params=pltpu.CompilerParams(
            dimension_semantics=("parallel", "arbitrary"),
            vmem_limit_bytes=vmem_limit,
        ),
        cost_estimate=pl.CostEstimate(
            flops=int(flops), transcendentals=0,
            bytes_accessed=int(bytes_accessed)),
    )(*operands)

    return out_padded[:, :F_out]


if __name__ == "__main__":
    def make_case(key, N, F_in, F_out):
        k_x, k_adj, k_w, k_b = jax.random.split(key, 4)
        x = jax.random.normal(k_x, (N, F_in), dtype=jnp.float32)
        adj_raw = jax.random.uniform(k_adj, (N, N), dtype=jnp.float32)
        adj = adj_raw / jnp.sum(adj_raw, axis=1, keepdims=True)  # row-normalized
        # Parameter init mirrors reset_parameters(): uniform(-stdv, stdv).
        stdv = 1.0 / math.sqrt(F_out)
        w = jax.random.uniform(k_w, (F_in, F_out), minval=-stdv, maxval=stdv,
                               dtype=jnp.float32)
        b = jax.random.uniform(k_b, (F_out,), minval=-stdv, maxval=stdv,
                               dtype=jnp.float32)
        return x, adj, w, b

    def check(x, adj, w, b):
        out = jax.block_until_ready(graph_convolution(x, adj, w, b))
        assert out.shape == (x.shape[0], w.shape[1])
        ref = adj @ (x @ w) + b                 # full-f32 PyTorch forward
        assert jnp.allclose(out, ref, atol=5e-2, rtol=5e-2), \
            "mismatch vs f32 reference"

    key = jax.random.PRNGKey(0)
    k1, k2, k3 = jax.random.split(key, 3)

    # Case 1: tile-aligned N, F_in <= 128 -> fused in-kernel X@W path.
    check(*make_case(k1, 128, 64, 32))
    # Case 2: ragged N, F_in > 128 -> precomputed-support path + edge masking.
    check(*make_case(k2, 200, 192, 48))
    # Case 3: ragged N, small F_in -> fused path + edge masking.
    check(*make_case(k3, 200, 64, 32))

    print("KERNEL_OK")
</pallas_src>

<mosaic_0001>
module attributes {stable_mosaic.version = 11 : i64} {
  func.func @_gcn_fused_kernel(%arg0: i32, %arg1: i32, %arg2: memref<128x64xbf16, #tpu.memory_space<vmem>>, %arg3: memref<64x128xbf16, #tpu.memory_space<vmem>>, %arg4: memref<128x128xf32, #tpu.memory_space<vmem>>, %arg5: memref<1x128xf32, #tpu.memory_space<vmem>>, %arg6: memref<128x128xf32, #tpu.memory_space<vmem>>) attributes {dimension_semantics = [#tpu.dimension_semantics<parallel>, #tpu.dimension_semantics<arbitrary>], iteration_bounds = array<i64: 1, 1>, scalar_prefetch = 0 : i64, scratch_operands = 0 : i64, tpu.core_type = #tpu.core_type<tc>, window_params = [{transform_indices = @transform_0, window_bounds = array<i64: 128, 64>}, {pipeline_mode = #tpu.pipeline_mode<synchronous>, transform_indices = @transform_1, window_bounds = array<i64: 64, 128>}, {transform_indices = @transform_2, window_bounds = array<i64: 128, 128>}, {pipeline_mode = #tpu.pipeline_mode<synchronous>, transform_indices = @transform_3, window_bounds = array<i64: 1, 128>}, {transform_indices = @transform_4, window_bounds = array<i64: 128, 128>}]} {
    %c0_i32 = arith.constant 0 : i32
    %0 = arith.cmpi eq, %arg1, %c0_i32 : i32
    %1 = arith.extui %0 : i1 to i32
    %c0_i32_0 = arith.constant 0 : i32
    %2 = arith.cmpi ne, %1, %c0_i32_0 : i32
    scf.if %2 {
      %cst_13 = arith.constant 0.000000e+00 : f32
      %16 = vector.broadcast %cst_13 : f32 to vector<128x128xf32>
      %c0_14 = arith.constant 0 : index
      %c0_15 = arith.constant 0 : index
      %17 = vector.load %arg6[%c0_14, %c0_15] : memref<128x128xf32, #tpu.memory_space<vmem>>, vector<128x128xf32>
      tpu.vector_store %arg6[%c0_14, %c0_15], %16 {strides = array<i32>} : memref<128x128xf32, #tpu.memory_space<vmem>>, vector<128x128xf32>,
    } else {
    }
    %c0 = arith.constant 0 : index
    %c0_1 = arith.constant 0 : index
    %3 = vector.load %arg2[%c0, %c0_1] : memref<128x64xbf16, #tpu.memory_space<vmem>>, vector<128x64xbf16>
    %c0_2 = arith.constant 0 : index
    %c0_3 = arith.constant 0 : index
    %4 = vector.load %arg3[%c0_2, %c0_3] : memref<64x128xbf16, #tpu.memory_space<vmem>>, vector<64x128xbf16>
    %cst = arith.constant dense<0.000000e+00> : vector<128x128xf32>
    %5 = tpu.matmul %3, %4, %cst {dimension_numbers = #tpu.dot_dimension_numbers<[1], [0], [0], [1], [0, 0, 1, 1], [], []>} : vector<128x64xbf16>, vector<64x128xbf16>, vector<128x128xf32> -> vector<128x128xf32>
    %c0_4 = arith.constant 0 : index
    %c0_5 = arith.constant 0 : index
    %6 = vector.load %arg4[%c0_4, %c0_5] : memref<128x128xf32, #tpu.memory_space<vmem>>, vector<128x128xf32>
    %7 = arith.truncf %6 : vector<128x128xf32> to vector<128x128xbf16>
    %c0_6 = arith.constant 0 : index
    %c0_7 = arith.constant 0 : index
    %8 = vector.load %arg6[%c0_6, %c0_7] : memref<128x128xf32, #tpu.memory_space<vmem>>, vector<128x128xf32>
    %9 = arith.truncf %5 : vector<128x128xf32> to vector<128x128xbf16>
    %cst_8 = arith.constant dense<0.000000e+00> : vector<128x128xf32>
    %10 = tpu.matmul %7, %9, %cst_8 {dimension_numbers = #tpu.dot_dimension_numbers<[1], [0], [0], [1], [0, 0, 1, 1], [], []>} : vector<128x128xbf16>, vector<128x128xbf16>, vector<128x128xf32> -> vector<128x128xf32>
    %11 = arith.addf %8, %10 : vector<128x128xf32>
    %c0_9 = arith.constant 0 : index
    %c0_10 = arith.constant 0 : index
    %12 = vector.load %arg6[%c0_9, %c0_10] : memref<128x128xf32, #tpu.memory_space<vmem>>, vector<128x128xf32>
    tpu.vector_store %arg6[%c0_9, %c0_10], %11 {strides = array<i32>} : memref<128x128xf32, #tpu.memory_space<vmem>>, vector<128x128xf32>,
    %c0_i32_11 = arith.constant 0 : i32
    %13 = arith.cmpi eq, %arg1, %c0_i32_11 : i32
    %14 = arith.extui %13 : i1 to i32
    %c0_i32_12 = arith.constant 0 : i32
    %15 = arith.cmpi ne, %14, %c0_i32_12 : i32
    scf.if %15 {
      %c0_13 = arith.constant 0 : index
      %c0_14 = arith.constant 0 : index
      %16 = vector.load %arg6[%c0_13, %c0_14] : memref<128x128xf32, #tpu.memory_space<vmem>>, vector<128x128xf32>
      %c0_15 = arith.constant 0 : index
      %c0_16 = arith.constant 0 : index
      %17 = vector.load %arg5[%c0_15, %c0_16] : memref<1x128xf32, #tpu.memory_space<vmem>>, vector<1x128xf32>
      %18 = vector.broadcast %17 : vector<1x128xf32> to vector<128x128xf32>
      %19 = arith.addf %16, %18 : vector<128x128xf32>
      %c0_17 = arith.constant 0 : index
      %c0_18 = arith.constant 0 : index
      %20 = vector.load %arg6[%c0_17, %c0_18] : memref<128x128xf32, #tpu.memory_space<vmem>>, vector<128x128xf32>
      tpu.vector_store %arg6[%c0_17, %c0_18], %19 {strides = array<i32>} : memref<128x128xf32, #tpu.memory_space<vmem>>, vector<128x128xf32>,
    } else {
    }
    return
  }
  func.func @transform_0(%arg0: i32, %arg1: i32) -> (i32, i32) {
    %c0_i32 = arith.constant 0 : i32
    %c0_i32_0 = arith.constant 0 : i32
    return %arg1, %c0_i32 : i32, i32
  }
  func.func @transform_1(%arg0: i32, %arg1: i32) -> (i32, i32) {
    %c0_i32 = arith.constant 0 : i32
    %c0_i32_0 = arith.constant 0 : i32
    %c0_i32_1 = arith.constant 0 : i32
    return %c0_i32, %c0_i32_0 : i32, i32
  }
  func.func @transform_2(%arg0: i32, %arg1: i32) -> (i32, i32) {
    %c0_i32 = arith.constant 0 : i32
    return %arg0, %arg1 : i32, i32
  }
  func.func @transform_3(%arg0: i32, %arg1: i32) -> (i32, i32) {
    %c0_i32 = arith.constant 0 : i32
    %c0_i32_0 = arith.constant 0 : i32
    %c0_i32_1 = arith.constant 0 : i32
    return %c0_i32, %c0_i32_0 : i32, i32
  }
  func.func @transform_4(%arg0: i32, %arg1: i32) -> (i32, i32) {
    %c0_i32 = arith.constant 0 : i32
    %c0_i32_0 = arith.constant 0 : i32
    return %arg0, %c0_i32 : i32, i32
  }
}

</mosaic_0001>

<bundles_post_ra>
// kernel: graph_convolution.1
= control target key start
LH: loop header
LB: loop body
LE: loop exit
PB: predicated region body
PF: predicated region fallthrough
CT: control target
= control target key end

     0   :  { %vm126_vm0 = vcmask 523264   ;;  %s789_s1 = inlined_call_operand.vmem [shape: bf16[64,128], index: 1, kind: input, shape index: {}]   ;;  %s790_s0 = inlined_call_operand.vmem [shape: bf16[128,64], index: 0, kind: input, shape index: {}]   ;;  %s791_s2 = inlined_call_operand.vmem [shape: f32[128,128], index: 2, kind: input, shape index: {}]   ;;  %s792_s3 = inlined_call_operand.vmem [shape: f32[1,128], index: 3, kind: input, shape index: {}]   ;;  %s793_s4 = inlined_call_operand.vmem [shape: f32[128,128], index: 4, kind: output, shape index: {}]  }
   0x1   :  { %v609_v0 = vld [vmem:[%s789_s1 + $0x18] sm:$0xff]   ;;  %v610_v1 = vld [vmem:[%s789_s1 + $0x10] sm:$0xff]   ;;  %v611_v2 = vld [vmem:[%s789_s1 + $0x8] sm:$0xff]  }
   0x2   :  { %536 = vmatprep.subr.bf16.mxu0 %v609_v0  ;;  %v613_v3 = vld [vmem:[%s790_s0] sm:$0xff]   ;;  %v614_v5 = vld [vmem:[%s790_s0 + $0x8] sm:$0xff]   ;;  %v615_v6 = vld [vmem:[%s790_s0 + $0x10] sm:$0xff]  }
   0x3   :  { %537 = vmatpush3.bf16.msra.mxu0 %v609_v0  ;;  %544 = vmatprep.mubr.msk.bf16.mxu0 %vm126_vm0, %v613_v3  ;;  %v612_v4 = vld [vmem:[%s789_s1] sm:$0xff]   ;;  %v616_v7 = vld [vmem:[%s790_s0 + $0x18] sm:$0xff]   ;;  %v618_v9 = vld [vmem:[%s790_s0 + $0x28] sm:$0xff]  }
   0x4   :  { %538 = vmatprep.subr.bf16.mxu0 %v610_v1  ;;  %v617_v8 = vld [vmem:[%s790_s0 + $0x20] sm:$0xff]   ;;  %v619_v10 = vld [vmem:[%s790_s0 + $0x30] sm:$0xff]   ;;  %v620_v11 = vld [vmem:[%s790_s0 + $0x38] sm:$0xff]  }
   0x5   :  { %v252_v12 = vld [vmem:[%s791_s2 + $0x20] sm:$0xff]  ;;  %v253_v13 = vld [vmem:[%s791_s2 + $0x28] sm:$0xff]  ;;  %v254_v42 = vld [vmem:[%s791_s2 + $0x30] sm:$0xff] }
   0x6   :  { %v266_v14 = vpack.c.bf16 %v253_v13, %v252_v12  ;;  %v248_v15 = vld [vmem:[%s791_s2] sm:$0xff]  ;;  %v249_v16 = vld [vmem:[%s791_s2 + $0x8] sm:$0xff]  ;;  %v255_v43 = vld [vmem:[%s791_s2 + $0x38] sm:$0xff] }
   0x7   :  { %539 = vmatpush3.bf16.msra.mxu0 %v610_v1  ;;  %v264_v17 = vpack.c.bf16 %v249_v16, %v248_v15  ;;  %v250_v44 = vld [vmem:[%s791_s2 + $0x10] sm:$0xff]  ;;  %v251_v45 = vld [vmem:[%s791_s2 + $0x18] sm:$0xff]  ;;  %v256_v46 = vld [vmem:[%s791_s2 + $0x40] sm:$0xff]  ;;  %v267_v48 = vpack.c.bf16 %v255_v43, %v254_v42 }
   0x8   :  { %540 = vmatprep.subr.bf16.mxu0 %v611_v2  ;;  %580 = vmatprep.mubr.bf16.mxu1 %v266_v14  ;;  %v257_v47 = vld [vmem:[%s791_s2 + $0x48] sm:$0xff]  ;;  %v265_v49 = vpack.c.bf16 %v251_v45, %v250_v44  ;;  %v258_v51 = vld [vmem:[%s791_s2 + $0x50] sm:$0xff]  ;;  %v259_v52 = vld [vmem:[%s791_s2 + $0x58] sm:$0xff] }
   0x9   :  { %v268_v50 = vpack.c.bf16 %v257_v47, %v256_v46  ;;  %v260_v53 = vld [vmem:[%s791_s2 + $0x60] sm:$0xff]  ;;  %v261_v54 = vld [vmem:[%s791_s2 + $0x68] sm:$0xff]  ;;  %v269_v55 = vpack.c.bf16 %v259_v52, %v258_v51  ;;  %v262_v57 = vld [vmem:[%s791_s2 + $0x70] sm:$0xff] }
   0xa   :  { %v270_v56 = vpack.c.bf16 %v261_v54, %v260_v53  ;;  %v263_v58 = vld [vmem:[%s791_s2 + $0x78] sm:$0xff]  ;;  %v507_v61 = vld [vmem:[%s792_s3] ss:$0 sm:$0xff] }
   0xb   :  { %541 = vmatpush3.bf16.msra.mxu0 %v611_v2  ;;  %v271_v59 = vpack.c.bf16 %v263_v58, %v262_v57 }
   0xc   :  { %542 = vmatprep.subr.bf16.mxu0 %v612_v4 }
   0xf   :  { %543 = vmatpush3.bf16.msra.mxu0 %v612_v4 }
  0x12   :  { %545 = vmatmul.mubr.msk.bf16.vlgmr.msra.gmra.mxu0 %vm126_vm0, %v614_v5 }
  0x13   :  { %548 = vmatprep.mubr.msk.bf16.mxu0 %vm126_vm0, %v615_v6 }
  0x1a   :  { %549 = vmatmul.mubr.msk.bf16.gmra.mxu0 %vm126_vm0, %v616_v7 }
  0x1b   :  { %552 = vmatprep.mubr.msk.bf16.mxu0 %vm126_vm0, %v617_v8 }
  0x22   :  { %553 = vmatmul.mubr.msk.bf16.gmra.mxu0 %vm126_vm0, %v618_v9 }
  0x23   :  { %556 = vmatprep.mubr.msk.bf16.mxu0 %vm126_vm0, %v619_v10 }
  0x2a   :  { %557 = vmatmul.mubr.msk.bf16.gmra.mxu0 %vm126_vm0, %v620_v11 }
  0x2b   :  { %576 = vmatprep.mubr.bf16.mxu0 %v264_v17 }
  0xd2   :  { %v546_v18 = vpop.f32.mrf.mxu0 }
  0xd4   :  { %v185_v19 = vpop.f32.mrf.mxu0 }
  0xd6   :  { %v547_v20 = vpop.f32.mrf.mxu0 }
  0xd7   :  { %v289_v40 = vpack.c.bf16 %v547_v20, %v546_v18 }
  0xd8   :  { %v188_v21 = vpop.f32.mrf.mxu0 }
  0xd9   :  { %v288_v41 = vpack.c.bf16 %v188_v21, %v185_v19 }
  0xda   :  { %v550_v22 = vpop.f32.mrf.mxu0 }
  0xdc   :  { %v201_v23 = vpop.f32.mrf.mxu0 }
  0xde   :  { %v551_v24 = vpop.f32.mrf.mxu0 }
  0xdf   :  { %v291_v38 = vpack.c.bf16 %v551_v24, %v550_v22 }
  0xe0   :  { %v204_v25 = vpop.f32.mrf.mxu0 }
  0xe1   :  { %v290_v39 = vpack.c.bf16 %v204_v25, %v201_v23 }
  0xe2   :  { %v554_v26 = vpop.f32.mrf.mxu0 }
  0xe4   :  { %v217_v27 = vpop.f32.mrf.mxu0 }
  0xe6   :  { %v555_v28 = vpop.f32.mrf.mxu0 }
  0xe7   :  { %v293_v36 = vpack.c.bf16 %v555_v28, %v554_v26 }
  0xe8   :  { %v220_v29 = vpop.f32.mrf.mxu0 }
  0xe9   :  { %v292_v37 = vpack.c.bf16 %v220_v29, %v217_v27 }
  0xea   :  { %v558_v30 = vpop.f32.mrf.mxu0 }
  0xec   :  { %v233_v31 = vpop.f32.mrf.mxu0 }
  0xee   :  { %v559_v32 = vpop.f32.mrf.mxu0 }
  0xef   :  { %v295_v33 = vpack.c.bf16 %v559_v32, %v558_v30 }
  0xf0   :  { %v236_v34 = vpop.f32.mrf.mxu0 }
  0xf1   :  { %v294_v35 = vpack.c.bf16 %v236_v34, %v233_v31  ;;  %560 = vmatprep.subr.bf16.mxu0 %v295_v33  ;;  %592 = vmatprep.subr.bf16.mxu1 %v295_v33 }
  0xf2   :  { %561 = vmatpush3.bf16.msra.mxu0 %v295_v33  ;;  %600 = vmatpush3.bf16.msra.mxu1 %v295_v33 }
  0xf3   :  { %562 = vmatprep.subr.bf16.mxu0 %v294_v35  ;;  %593 = vmatprep.subr.bf16.mxu1 %v294_v35 }
  0xf6   :  { %563 = vmatpush3.bf16.msra.mxu0 %v294_v35  ;;  %601 = vmatpush3.bf16.msra.mxu1 %v294_v35 }
  0xf7   :  { %564 = vmatprep.subr.bf16.mxu0 %v293_v36  ;;  %594 = vmatprep.subr.bf16.mxu1 %v293_v36 }
  0xfa   :  { %565 = vmatpush3.bf16.msra.mxu0 %v293_v36  ;;  %602 = vmatpush3.bf16.msra.mxu1 %v293_v36 }
  0xfb   :  { %566 = vmatprep.subr.bf16.mxu0 %v292_v37  ;;  %595 = vmatprep.subr.bf16.mxu1 %v292_v37 }
  0xfe   :  { %567 = vmatpush3.bf16.msra.mxu0 %v292_v37  ;;  %603 = vmatpush3.bf16.msra.mxu1 %v292_v37 }
  0xff   :  { %568 = vmatprep.subr.bf16.mxu0 %v291_v38  ;;  %596 = vmatprep.subr.bf16.mxu1 %v291_v38 }
 0x102   :  { %569 = vmatpush3.bf16.msra.mxu0 %v291_v38  ;;  %604 = vmatpush3.bf16.msra.mxu1 %v291_v38 }
 0x103   :  { %570 = vmatprep.subr.bf16.mxu0 %v290_v39  ;;  %597 = vmatprep.subr.bf16.mxu1 %v290_v39 }
 0x106   :  { %571 = vmatpush3.bf16.msra.mxu0 %v290_v39  ;;  %605 = vmatpush3.bf16.msra.mxu1 %v290_v39 }
 0x107   :  { %572 = vmatprep.subr.bf16.mxu0 %v289_v40  ;;  %598 = vmatprep.subr.bf16.mxu1 %v289_v40 }
 0x10a   :  { %573 = vmatpush3.bf16.msra.mxu0 %v289_v40  ;;  %606 = vmatpush3.bf16.msra.mxu1 %v289_v40 }
 0x10b   :  { %574 = vmatprep.subr.bf16.mxu0 %v288_v41  ;;  %599 = vmatprep.subr.bf16.mxu1 %v288_v41 }
 0x10e   :  { %575 = vmatpush3.bf16.msra.mxu0 %v288_v41  ;;  %607 = vmatpush3.bf16.msra.mxu1 %v288_v41 }
 0x111   :  { %581 = vmatmul.mubr.bf16.vlgmr.msra.gmra.mxu1 %v267_v48  ;;  %577 = vmatmul.mubr.bf16.vlgmr.msra.gmra.mxu0 %v265_v49 }
 0x112   :  { %584 = vmatprep.mubr.bf16.mxu1 %v268_v50 }
 0x119   :  { %585 = vmatmul.mubr.bf16.gmra.mxu1 %v269_v55 }
 0x11a   :  { %588 = vmatprep.mubr.bf16.mxu1 %v270_v56 }
 0x121   :  { %589 = vmatmul.mubr.bf16.gmra.mxu1 %v271_v59 }
 0x1d1   :  { %v582_v60 = vpop.f32.mrf.mxu1  ;;  %v578_v62 = vpop.f32.mrf.mxu0 }
 0x1d2   :  { %v457_v1 = vadd.f32 %v582_v60, %v507_v61  ;;  %v453_v2 = vadd.f32 %v578_v62, %v507_v61 }
 0x1d3   :  { %v346_v63 = vpop.f32.mrf.mxu1  ;;  %v330_v0 = vpop.f32.mrf.mxu0 }
 0x1d4   :  { %473 = vst [vmem:[%s793_s4 + $0x30] sm:$0xff] %v457_v1  ;;  %v455_v5 = vadd.f32 %v507_v61, %v346_v63  ;;  %469 = vst [vmem:[%s793_s4 + $0x10] sm:$0xff] %v453_v2  ;;  %v451_v6 = vadd.f32 %v507_v61, %v330_v0 }
 0x1d5   :  { %v583_v3 = vpop.f32.mrf.mxu1  ;;  %v579_v4 = vpop.f32.mrf.mxu0 }
 0x1d6   :  { %471 = vst [vmem:[%s793_s4 + $0x20] sm:$0xff] %v455_v5  ;;  %v458_v9 = vadd.f32 %v583_v3, %v507_v61  ;;  %467 = vst [vmem:[%s793_s4] sm:$0xff] %v451_v6  ;;  %v454_v10 = vadd.f32 %v579_v4, %v507_v61 }
 0x1d7   :  { %v349_v7 = vpop.f32.mrf.mxu1  ;;  %v333_v8 = vpop.f32.mrf.mxu0 }
 0x1d8   :  { %474 = vst [vmem:[%s793_s4 + $0x38] sm:$0xff] %v458_v9  ;;  %v456_v12 = vadd.f32 %v507_v61, %v349_v7  ;;  %470 = vst [vmem:[%s793_s4 + $0x18] sm:$0xff] %v454_v10  ;;  %v452_v13 = vadd.f32 %v507_v61, %v333_v8 }
 0x1d9   :  { %v586_v11 = vpop.f32.mrf.mxu1 }
 0x1da   :  { %472 = vst [vmem:[%s793_s4 + $0x28] sm:$0xff] %v456_v12  ;;  %v461_v15 = vadd.f32 %v586_v11, %v507_v61  ;;  %468 = vst [vmem:[%s793_s4 + $0x8] sm:$0xff] %v452_v13 }
 0x1db   :  { %v362_v14 = vpop.f32.mrf.mxu1 }
 0x1dc   :  { %477 = vst [vmem:[%s793_s4 + $0x50] sm:$0xff] %v461_v15  ;;  %v459_v17 = vadd.f32 %v507_v61, %v362_v14 }
 0x1dd   :  { %v587_v16 = vpop.f32.mrf.mxu1 }
 0x1de   :  { %475 = vst [vmem:[%s793_s4 + $0x40] sm:$0xff] %v459_v17  ;;  %v462_v19 = vadd.f32 %v587_v16, %v507_v61 }
 0x1df   :  { %v365_v18 = vpop.f32.mrf.mxu1 }
 0x1e0   :  { %478 = vst [vmem:[%s793_s4 + $0x58] sm:$0xff] %v462_v19  ;;  %v460_v21 = vadd.f32 %v507_v61, %v365_v18 }
 0x1e1   :  { %v590_v20 = vpop.f32.mrf.mxu1 }
 0x1e2   :  { %476 = vst [vmem:[%s793_s4 + $0x48] sm:$0xff] %v460_v21  ;;  %v465_v23 = vadd.f32 %v590_v20, %v507_v61 }
 0x1e3   :  { %v378_v22 = vpop.f32.mrf.mxu1 }
 0x1e4   :  { %481 = vst [vmem:[%s793_s4 + $0x70] sm:$0xff] %v465_v23  ;;  %v463_v25 = vadd.f32 %v507_v61, %v378_v22 }
 0x1e5   :  { %v591_v24 = vpop.f32.mrf.mxu1 }
 0x1e6   :  { %479 = vst [vmem:[%s793_s4 + $0x60] sm:$0xff] %v463_v25  ;;  %v466_v27 = vadd.f32 %v591_v24, %v507_v61 }
 0x1e7   :  { %v381_v26 = vpop.f32.mrf.mxu1 }
 0x1e8   :  { %482 = vst [vmem:[%s793_s4 + $0x78] sm:$0xff] %v466_v27  ;;  %v464_v28 = vadd.f32 %v507_v61, %v381_v26 }
 0x1ea   :  { %480 = vst [vmem:[%s793_s4 + $0x68] sm:$0xff] %v464_v28 }

</bundles_post_ra>
